<compile_context>
chip_gen: v6e
topology: v6e:2x2x1
jax: 0.10.0
libtpu: 0.0.40
codegen_flags: <defaults>
</compile_context>

<pallas_src>
import functools

import jax
import jax.numpy as jnp
from jax.experimental import pallas as pl
from jax.experimental.pallas import tpu as pltpu


def _layernorm_cnn_kernel(x_ref, w_ref, b_ref, o_ref, *, eps, inv_n, n_pad):
    # x_ref: (Bt, R, L) -- Bt samples, each flattened lane-dense to (R, L=128).
    # w_ref/b_ref: (R, 1) per-row affine (channel-aligned rows) or (R, L).
    shift = x_ref[:, 0:1, 0:1].astype(jnp.float32)           # (Bt, 1, 1)

    # Shifted single-pass statistics: one read of x feeds both sums, and the
    # per-sample pivot removes the E[x^2]-mean^2 cancellation problem.
    xs = x_ref[...].astype(jnp.float32) - shift               # (Bt, R, L)
    s = jnp.sum(xs, axis=(1, 2), keepdims=True)               # (Bt, 1, 1)
    ss = jnp.sum(xs * xs, axis=(1, 2), keepdims=True)         # (Bt, 1, 1)
    if n_pad:
        # Zero padding contributed (-shift) to s and shift^2 to ss per padded
        # element; undo it so the stats cover the true N elements only.
        s = s + n_pad * shift
        ss = ss - n_pad * (shift * shift)

    mean_s = s * inv_n                                        # mean of (x - shift)
    var = jnp.maximum(ss * inv_n - mean_s * mean_s, 0.0)
    inv_std = jax.lax.rsqrt(var + eps)

    w = w_ref[...].astype(jnp.float32)[None]                  # (1, R, 1|L)
    b = b_ref[...].astype(jnp.float32)[None]                  # (1, R, 1|L)

    # Re-read x for the normalize pass (no full-block f32 copy kept live
    # across the reductions when the input dtype is sub-f32).
    xn = (x_ref[...].astype(jnp.float32) - shift - mean_s) * inv_std
    o_ref[...] = (xn * w + b).astype(o_ref.dtype)


def layernorm_cnn(x, weight, bias, eps=1e-5):
    """x: (B, C, H, W) NCHW; weight/bias: (1, C, 1, 1). Returns (B, C, H, W)."""
    B, C, H, W = x.shape
    HW = H * W
    N = C * HW
    L = 128

    w_c = weight.reshape(C)
    b_c = bias.reshape(C)

    if HW % L == 0:
        # Channel-aligned lane-dense rows: each 128-wide row belongs to exactly
        # one channel, so the affine stays (R, 1) and is lane-broadcast in the
        # kernel (free on the VPU). No padding.
        rows_per_ch = HW // L
        R = C * rows_per_ch
        n_pad = 0
        x_flat = x.reshape(B, R, L)
        w_in = jnp.repeat(w_c, rows_per_ch).reshape(R, 1)
        b_in = jnp.repeat(b_c, rows_per_ch).reshape(R, 1)
    else:
        # Fallback: zero-pad each flattened sample to a lane multiple so the
        # store path uses full-width vst. Rows may span channels here, so the
        # affine is materialized per element (still small and fetched once).
        Np = pl.cdiv(N, L) * L
        n_pad = Np - N
        R = Np // L
        x_flat = jnp.pad(x.reshape(B, N), ((0, 0), (0, n_pad))).reshape(B, R, L)
        w_el = jnp.broadcast_to(w_c[:, None], (C, HW)).reshape(N)
        b_el = jnp.broadcast_to(b_c[:, None], (C, HW)).reshape(N)
        w_in = jnp.pad(w_el, (0, n_pad), constant_values=1.0).reshape(R, L)
        b_in = jnp.pad(b_el, (0, n_pad)).reshape(R, L)

    # ---- grid / block sizing -------------------------------------------------
    bytes_per_sample = R * L * x.dtype.itemsize
    target_block_bytes = 2 << 20          # ~2 MiB: amortizes ~0.35 us/step and
                                          # stays hidden behind DMA on v7x too.
    Bt = max(1, min(B, target_block_bytes // max(bytes_per_sample, 1)))
    if B >= 2:
        # Keep >= 2 grid steps so the ("parallel",) batch axis can shard across
        # the two TensorCores on v7x.
        Bt = min(Bt, (B + 1) // 2)
    grid = (pl.cdiv(B, Bt),)              # ragged last block OK: stats are
                                          # per-sample; OOB writes are dropped.

    # VMEM budget: double-buffered x in + out, single-buffered affine, plus the
    # transient f32 block used by the stats, plus headroom.
    block_bytes = Bt * R * L * x.dtype.itemsize
    affine_bytes = 2 * w_in.size * w_in.dtype.itemsize
    f32_block = Bt * R * L * 4
    needed = 4 * block_bytes + affine_bytes + f32_block + (2 << 20)
    vmem_limit = int(min(max(needed, 16 << 20), 64 << 20))
    # TODO(synk): samples whose padded size exceeds a few MiB still map to a
    # single block; a chunked grid axis over R with per-sample sum/sum-sq
    # scratch (pl.when init/finalize) is needed to bound VMEM for very large
    # feature maps on v7x (64 MiB physical VMEM).

    kernel = functools.partial(
        _layernorm_cnn_kernel,
        eps=float(eps), inv_n=1.0 / float(N), n_pad=int(n_pad))

    affine_shape = w_in.shape
    out_flat = pl.pallas_call(
        kernel,
        out_shape=jax.ShapeDtypeStruct((B, R, L), x.dtype),
        grid_spec=pltpu.PrefetchScalarGridSpec(
            num_scalar_prefetch=0,
            grid=grid,
            in_specs=[
                pl.BlockSpec((Bt, R, L), lambda i: (i, 0, 0)),
                # Constant block index -> fetched once; single buffer suffices.
                pl.BlockSpec(affine_shape, lambda i: (0, 0),
                             pipeline_mode=pl.Buffered(1)),
                pl.BlockSpec(affine_shape, lambda i: (0, 0),
                             pipeline_mode=pl.Buffered(1)),
            ],
            out_specs=pl.BlockSpec((Bt, R, L), lambda i: (i, 0, 0)),
        ),
        compiler_params=pltpu.CompilerParams(
            dimension_semantics=("parallel",),
            vmem_limit_bytes=vmem_limit,
        ),
    )(x_flat, w_in, b_in)

    if n_pad:
        return out_flat.reshape(B, R * L)[:, :N].reshape(B, C, H, W)
    return out_flat.reshape(B, C, H, W)


def _reference(x, weight, bias, eps=1e-5):
    mean = jnp.mean(x, axis=(1, 2, 3), keepdims=True)
    var = jnp.mean((x - mean) ** 2, axis=(1, 2, 3), keepdims=True)
    normalized = (x - mean) / jnp.sqrt(var + eps)
    return weight * normalized + bias


if __name__ == "__main__":
    B, C, H, W = 2, 4, 16, 16
    key = jax.random.PRNGKey(0)
    kx, kw, kb = jax.random.split(key, 3)

    x = jax.random.normal(kx, (B, C, H, W), dtype=jnp.float32)
    # Module __init__ is ones/zeros; perturb deterministically so the
    # per-channel affine path is actually exercised.
    weight = 1.0 + 0.1 * jax.random.normal(kw, (1, C, 1, 1), dtype=jnp.float32)
    bias = 0.1 * jax.random.normal(kb, (1, C, 1, 1), dtype=jnp.float32)

    out = layernorm_cnn(x, weight, bias, eps=1e-5)
    out = jax.block_until_ready(out)

    ref = _reference(x, weight, bias, eps=1e-5)
    assert out.shape == (B, C, H, W)
    max_err = float(jnp.max(jnp.abs(out - ref)))
    assert jnp.allclose(out, ref, atol=2e-5, rtol=2e-5), (
        f"mismatch vs reference (max abs err {max_err})")

    print("KERNEL_OK")
</pallas_src>

<mosaic_0001>
module attributes {stable_mosaic.version = 11 : i64} {
  func.func @_layernorm_cnn_kernel(%arg0: i32, %arg1: memref<1x8x128xf32, #tpu.memory_space<vmem>>, %arg2: memref<8x1xf32, #tpu.memory_space<vmem>>, %arg3: memref<8x1xf32, #tpu.memory_space<vmem>>, %arg4: memref<1x8x128xf32, #tpu.memory_space<vmem>>) attributes {dimension_semantics = [#tpu.dimension_semantics<parallel>], iteration_bounds = array<i64: 2>, scalar_prefetch = 0 : i64, scratch_operands = 0 : i64, tpu.core_type = #tpu.core_type<tc>, window_params = [{transform_indices = @transform_0, window_bounds = array<i64: 1, 8, 128>}, {pipeline_mode = #tpu.pipeline_mode<synchronous>, transform_indices = @transform_1, window_bounds = array<i64: 8, 1>}, {pipeline_mode = #tpu.pipeline_mode<synchronous>, transform_indices = @transform_2, window_bounds = array<i64: 8, 1>}, {transform_indices = @transform_3, window_bounds = array<i64: 1, 8, 128>}]} {
    %c0 = arith.constant 0 : index
    %c0_0 = arith.constant 0 : index
    %c0_1 = arith.constant 0 : index
    %0 = vector.load %arg1[%c0, %c0_0, %c0_1] : memref<1x8x128xf32, #tpu.memory_space<vmem>>, vector<1x1x1xf32>
    %c0_2 = arith.constant 0 : index
    %c0_3 = arith.constant 0 : index
    %c0_4 = arith.constant 0 : index
    %1 = vector.load %arg1[%c0_2, %c0_3, %c0_4] : memref<1x8x128xf32, #tpu.memory_space<vmem>>, vector<1x8x128xf32>
    %2 = vector.broadcast %0 : vector<1x1x1xf32> to vector<1x8x128xf32>
    %3 = arith.subf %1, %2 : vector<1x8x128xf32>
    %cst = arith.constant dense<0.000000e+00> : vector<1xf32>
    %4 = vector.multi_reduction <add>, %3, %cst [1, 2] : vector<1x8x128xf32> to vector<1xf32>
    %5 = vector.shape_cast %4 : vector<1xf32> to vector<1x1x1xf32>
    %6 = arith.mulf %3, %3 : vector<1x8x128xf32>
    %cst_5 = arith.constant dense<0.000000e+00> : vector<1xf32>
    %7 = vector.multi_reduction <add>, %6, %cst_5 [1, 2] : vector<1x8x128xf32> to vector<1xf32>
    %8 = vector.shape_cast %7 : vector<1xf32> to vector<1x1x1xf32>
    %cst_6 = arith.constant 9.765625E-4 : f32
    %9 = vector.broadcast %cst_6 : f32 to vector<1x1x1xf32>
    %10 = arith.mulf %5, %9 : vector<1x1x1xf32>
    %cst_7 = arith.constant 9.765625E-4 : f32
    %11 = vector.broadcast %cst_7 : f32 to vector<1x1x1xf32>
    %12 = arith.mulf %8, %11 : vector<1x1x1xf32>
    %13 = arith.mulf %10, %10 : vector<1x1x1xf32>
    %14 = arith.subf %12, %13 : vector<1x1x1xf32>
    %cst_8 = arith.constant 0.000000e+00 : f32
    %15 = vector.broadcast %cst_8 : f32 to vector<1x1x1xf32>
    %16 = arith.maximumf %14, %15 : vector<1x1x1xf32>
    %cst_9 = arith.constant 9.99999974E-6 : f32
    %17 = vector.broadcast %cst_9 : f32 to vector<1x1x1xf32>
    %18 = arith.addf %16, %17 : vector<1x1x1xf32>
    %19 = math.rsqrt %18 : vector<1x1x1xf32>
    %c0_10 = arith.constant 0 : index
    %c0_11 = arith.constant 0 : index
    %20 = vector.load %arg2[%c0_10, %c0_11] : memref<8x1xf32, #tpu.memory_space<vmem>>, vector<8x1xf32>
    %21 = vector.shape_cast %20 : vector<8x1xf32> to vector<1x8x1xf32>
    %c0_12 = arith.constant 0 : index
    %c0_13 = arith.constant 0 : index
    %22 = vector.load %arg3[%c0_12, %c0_13] : memref<8x1xf32, #tpu.memory_space<vmem>>, vector<8x1xf32>
    %23 = vector.shape_cast %22 : vector<8x1xf32> to vector<1x8x1xf32>
    %c0_14 = arith.constant 0 : index
    %c0_15 = arith.constant 0 : index
    %c0_16 = arith.constant 0 : index
    %24 = vector.load %arg1[%c0_14, %c0_15, %c0_16] : memref<1x8x128xf32, #tpu.memory_space<vmem>>, vector<1x8x128xf32>
    %25 = vector.broadcast %0 : vector<1x1x1xf32> to vector<1x8x128xf32>
    %26 = arith.subf %24, %25 : vector<1x8x128xf32>
    %27 = vector.broadcast %10 : vector<1x1x1xf32> to vector<1x8x128xf32>
    %28 = arith.subf %26, %27 : vector<1x8x128xf32>
    %29 = vector.broadcast %19 : vector<1x1x1xf32> to vector<1x8x128xf32>
    %30 = arith.mulf %28, %29 : vector<1x8x128xf32>
    %31 = vector.broadcast %21 : vector<1x8x1xf32> to vector<1x8x128xf32>
    %32 = arith.mulf %30, %31 : vector<1x8x128xf32>
    %33 = vector.broadcast %23 : vector<1x8x1xf32> to vector<1x8x128xf32>
    %34 = arith.addf %32, %33 : vector<1x8x128xf32>
    %c0_17 = arith.constant 0 : index
    %c0_18 = arith.constant 0 : index
    %c0_19 = arith.constant 0 : index
    %35 = vector.load %arg4[%c0_17, %c0_18, %c0_19] : memref<1x8x128xf32, #tpu.memory_space<vmem>>, vector<1x8x128xf32>
    tpu.vector_store %arg4[%c0_17, %c0_18, %c0_19], %34 {strides = array<i32>} : memref<1x8x128xf32, #tpu.memory_space<vmem>>, vector<1x8x128xf32>,
    return
  }
  func.func @transform_0(%arg0: i32) -> (i32, i32, i32) {
    %c0_i32 = arith.constant 0 : i32
    %c0_i32_0 = arith.constant 0 : i32
    %c0_i32_1 = arith.constant 0 : i32
    return %arg0, %c0_i32, %c0_i32_0 : i32, i32, i32
  }
  func.func @transform_1(%arg0: i32) -> (i32, i32) {
    %c0_i32 = arith.constant 0 : i32
    %c0_i32_0 = arith.constant 0 : i32
    %c0_i32_1 = arith.constant 0 : i32
    return %c0_i32, %c0_i32_0 : i32, i32
  }
  func.func @transform_2(%arg0: i32) -> (i32, i32) {
    %c0_i32 = arith.constant 0 : i32
    %c0_i32_0 = arith.constant 0 : i32
    %c0_i32_1 = arith.constant 0 : i32
    return %c0_i32, %c0_i32_0 : i32, i32
  }
  func.func @transform_3(%arg0: i32) -> (i32, i32, i32) {
    %c0_i32 = arith.constant 0 : i32
    %c0_i32_0 = arith.constant 0 : i32
    %c0_i32_1 = arith.constant 0 : i32
    return %arg0, %c0_i32, %c0_i32_0 : i32, i32, i32
  }
}

</mosaic_0001>

<bundles_post_ra>
// kernel: tpu_custom_call.1
= control target key start
LH: loop header
LB: loop body
LE: loop exit
PB: predicated region body
PF: predicated region fallthrough
CT: control target
= control target key end

     0   :  { %8 = vsyncpa [#allocation3], 0  ;;  %s520_s0 = inlined_call_operand.vmem [shape: f32[2,8,128], index: 0, kind: input, shape index: {}]   ;;  %s521_s1 = inlined_call_operand.vmem [shape: f32[8,1], index: 1, kind: input, shape index: {}]   ;;  %s522_s2 = inlined_call_operand.vmem [shape: f32[8,1], index: 2, kind: input, shape index: {}]   ;;  %s523_s3 = inlined_call_operand.hbm [shape: f32[2,8,128], index: 3, kind: output, shape index: {}]  }
   0x1   :  { %10 = vsyncpa [#allocation3 + $0x1], 0  ;;  %s427_s12 = smov 0   ;;  %s429_s13 = smov 0  }
   0x2   :  { %s431_s14 = smov 0   ;;  %s433_s15 = smov 0  }
   0x3 LB: > { %s448_s16 = sadd.s32 4294967295, %s403_s15   ;;  %s287_s17 = sadd.s32 4294967294, %s403_s15   ;;  %s403_s15 = sphi %s433_s15, %s529_s15   ;;  %s399_s14 = sphi %s431_s14, %s528_s14   ;;  %s395_s13 = sphi %s429_s13, %s527_s13   ;;  %s391_s12 = sphi %s427_s12, %s526_s12  }
   0x4   : > { %s452_s18 = sadd.s32 1, %s403_s15   ;;  %s91_s19 = sadd.s32 1, %s399_s14 }
   0x5   : > { %s88_s20 = ssub.s32 %s403_s15, %s452_s18  ;;  %p101_p0 = scmp.ne.s32.totalorder %s399_s14, %s395_s13 }
   0x6   : > { %p89_p1 = scmp.eq.s32.totalorder %s88_s20, 0  ;;  %p102_p2 = scmp.eq.s32.totalorder %s448_s16, 1 }
   0x7   : > { %p107_p3 = scmp.ne.s32.totalorder %s395_s13, %s391_s12  ;;  %p108_p4 = scmp.eq.s32.totalorder %s287_s17, 1 }
   0x8   : > { %s463_s21 = scalar_select %p89_p1, %s399_s14, %s91_s19  }
   0x9   : > { %p465_p5 = por %p102_p2, %p101_p0  ;;  %p469_p6 = por %p108_p4, %p107_p3 }
   0xa   : > { %p290_p7 = scmp.ge.s32.totalorder %s403_s15, 1  ;;  %p139_p8 = scmp.lt.s32.totalorder %s403_s15, 3 }
   0xc   : > { %p140_p9 = pnand %p290_p7, %p139_p8 }
   0xd   : > { %p162_p10 = scmp.lt.s32.totalorder (!%p140_p9), %s448_s16, 1  ;;  %s159_s7 = sand.u32 (!%p140_p9), 1, %s395_s13  }
   0xe   : > { %143 = sbr.rel (%p140_p9) target bundleno = 272 (0x110), region = 32  ;;  %s291_s8 = sshll.u32 (!%p140_p9), %s159_s7, 3 }
   0xf   : > { %s294_s9 = sshll.u32 (!%p140_p9), %s448_s16, 7  ;;  %s161_s10 = scalar_lea.vmem (!%p140_p9), [#allocation2], %s291_s8 }
  0x10   : > { %s228_s11 = sshll.u32 (!%p140_p9), %s161_s10, 4  ;;  %s226_s20 = scalar_lea.hbm (!%p140_p9), %s523_s3, %s294_s9  ;;  %s229_s11 = int_to_ptr.vmem [resolvable:$true] %s228_s11 }
  0x11   : > { %s215_s24 = scalar_lea.sflag (!%p140_p9), [#allocation3], %s159_s7  ;;  %s343_s25 = scalar_lea.vmem (!%p140_p9), %s229_s11, 128 }
  0x12   : > { %p344_p11 = scmp.ne.s32.totalorder (!%p140_p9), %s229_s11, %s343_s25 }
  0x13   : > { %v197_v0 = vld [vmem:[%s521_s1] sm:$0xff]  ;;  %v405_v1 = vmov 0   ;;  %s163_s26 = scalar_select %p162_p10, %s448_s16, 1 }
  0x14   : > { %339 = vset.pattern.permute.xlu1 %v405_v1  ;;  %340 = vset.pattern.permute.xlu0 %v405_v1  ;;  %v198_v2 = vld [vmem:[%s522_s2] sm:$0xff]  ;;  %p345_p12 = pnand %p344_p11, %p465_p5 }
  0x15   : > { %203 = vperm.xlu1 %339, %v197_v0   ;;  %s292_s29 = sshll.u32 %s163_s26, 3  ;;  %s406_s26 = smov [#allocation2]  }
  0x16   : > { %s165_s5 = scalar_lea.vmem %s520_s0, %s292_s29  ;;  %p346_p13 = pneg %p345_p12 }
  0x17   : > { %v166_v3 = vld [vmem:[%s165_s5] sm:$0x1]  ;;  %s347_s27 = sshll.u32 %s406_s26, 4  ;;  %s348_s27 = int_to_ptr.vmem [resolvable:$false] %s347_s27 }
  0x18   : > { %297 = vpush %v166_v3  ;;  %v167_v4 = vld [vmem:[%s165_s5] sm:$0xff]  ;;  %s349_s16 = scalar_lea.vmem %s348_s27, 256  ;;  %p350_p0 = scmp.lt.s32.totalorder %s229_s11, %s348_s27 }
  0x19   : > { %209 = vperm.xlu1 %339, %v198_v2   ;;  %p351_p1 = scmp.lt.s32.totalorder %s349_s16, %s343_s25 }
  0x1b   : > { %p352_p2 = por %p351_p1, %p350_p0 }
  0x1d   : > { %p353_p3 = pnand %p352_p2, %p346_p13 }
  0x49   : > { %s298_s6 = spop %297 }
  0x4a   : > { %v170_v5 = vstv %s298_s6 }
  0x4b   : > { %v172_v6 = vsub.f32 %v167_v4, %v170_v5 }
  0x4d   : > { %173 = vadd.xlane.f32.xlu0 %v172_v6  ;;  %v181_v7 = vmul.f32 %v172_v6, %v172_v6 }
  0x51   : > { %182 = vadd.xlane.f32.xlu0 %v181_v7 }
  0x90   : > { %v204_v28 = vpop.permute.xlu1 %203 }
  0x94   : > { %v210_v33 = vpop.permute.xlu1 %209 }
  0xd6   : > { %v174_v8 = vpop.xlane.xlu0 %173 }
  0xd7   : > { %v175_v9 = vrot.slane %v174_v8, 4 }
  0xd9   : > { %v176_v10 = vadd.f32 %v175_v9, %v174_v8 }
  0xda   : > { %v183_v11 = vpop.xlane.xlu0 %182 }
  0xdb   : > { %v177_v12 = vrot.slane %v176_v10, 2  ;;  %v184_v13 = vrot.slane %v183_v11, 4 }
  0xdd   : > { %v178_v14 = vadd.f32 %v177_v12, %v176_v10  ;;  %v185_v15 = vadd.f32 %v184_v13, %v183_v11 }
  0xdf   : > { %v179_v16 = vrot.slane %v178_v14, 1  ;;  %v186_v17 = vrot.slane %v185_v15, 2 }
  0xe1   : > { %v180_v18 = vadd.f32 %v179_v16, %v178_v14  ;;  %v187_v19 = vadd.f32 %v186_v17, %v185_v15 }
  0xe3   : > { %v190_v20 = vmul.f32 0.0009765625, %v180_v18  ;;  %v188_v21 = vrot.slane %v187_v19, 1 }
  0xe5   : > { %v189_v22 = vadd.f32 %v188_v21, %v187_v19  ;;  %v192_v23 = vmul.f32 %v190_v20, %v190_v20  ;;  %v199_v29 = vsub.f32 %v172_v6, %v190_v20 }
  0xe7   : > { %v191_v24 = vmul.f32 0.0009765625, %v189_v22 }
  0xe9   : > { %v193_v25 = vsub.f32 %v191_v24, %v192_v23 }
  0xeb   : > { %v194_v26 = vmax.f32 %v193_v25, 0.0 }
  0xed   : > { %v195_v27 = vadd.f32 1e-05, %v194_v26 }
  0xef   : > { %341 = vrsqrt.f32 %v195_v27 }
  0xfc   : > { %v342_v30 = vpop.eup %341 }
  0xfd   : > { %v200_v31 = vmul.f32 %v342_v30, %v199_v29 }
  0xff   : > { %v206_v32 = vmul.f32 %v204_v28, %v200_v31 }
 0x101   : > { %v212_v34 = vadd.f32 %v210_v33, %v206_v32 }
 0x103   : > { %213 = vst [vmem:[%s161_s10] sm:$0xff] %v212_v34 }
 0x104   : > { %356 = shalt.err (!%p353_p3)
}
 0x105   : > { %s357_s28 = scalar_lea.hbm %s226_s20, 128  ;;  %s361_s4 = scalar_lea.hbm %s523_s3, 256 }
 0x106   : > { %p358_p4 = scmp.ne.s32.totalorder %s226_s20, %s357_s28  ;;  %p362_p9 = scmp.lt.s32.totalorder %s226_s20, %s523_s3 }
 0x107   : > { %p363_p10 = scmp.lt.s32.totalorder %s361_s4, %s357_s28 }
 0x108   : > { %p359_p7 = pnand %p358_p4, %p465_p5 }
 0x109   : > { %p364_p11 = por %p363_p10, %p362_p9 }
 0x10a   : > { %p360_p8 = pneg %p359_p7 }
 0x10c   : > { %p365_p12 = pnand %p364_p11, %p360_p8 }
 0x10e   : > { %368 = shalt.err (!%p365_p12)
}
 0x10f   : > { %299 = dma.vmem_to_hbm [thread:$0]  (%p465_p5), %s229_s11, 128, %s226_s20, %s215_s24  }
 0x110 PF: > { %p305_p13 = scmp.ge.s32.totalorder %s403_s15, 2  ;;  %s240_s7 = sand.u32 1, %s391_s12  }
 0x111   : > { %s241_s8 = scalar_lea.sflag [#allocation3], %s240_s7 }
 0x112   : > { %p302_p0 = pnand %p305_p13, %p469_p6 }
 0x114   : > { %p303_p1 = pneg %p302_p0 }
 0x116   : > { %386 = dma.done.wait (%p303_p1), %s241_s8, 128  }
 0x117   : > { %388 = vsyncadd (%p303_p1), %s241_s8, 4294967168  ;;  %p13_p2 = scmp.ge.s32.totalorder %s452_s18, 4   ;;  %s526_s12 = smov %s395_s13 }
 0x118   : > { %s527_s13 = smov %s399_s14  ;;  %s528_s14 = smov %s463_s21 }
 0x119   : > { %s529_s15 = smov %s452_s18  ;;  %15 = sbr.rel (!%p13_p2) target bundleno = 3 (0x3), region = 67 }
 0x11e   :  { %246 = vsyncpa [#allocation3], 1 }
 0x11f   :  { %248 = vsyncpa [#allocation3 + $0x1], 1 }

</bundles_post_ra>
